<compile_context>
chip_gen: v7x
topology: tpu7x:2x2x1
jax: 0.10.0
libtpu: 0.0.40
codegen_flags: <defaults>
</compile_context>

<pallas_src>
import jax
import jax.numpy as jnp
from jax.experimental import pallas as pl
from jax.experimental.pallas import tpu as pltpu


def _round_up(x, m):
    return ((x + m - 1) // m) * m


# --------------------------------------------------------------- kernels ----

def _mm_single_block_kernel(x_ref, w_ref, o_ref):
    # Whole problem lives in one VMEM block: a single MXU matmul.
    o_ref[...] = jnp.dot(
        x_ref[...], w_ref[...], preferred_element_type=jnp.float32
    ).astype(o_ref.dtype)


def _mm_tiled_kernel(x_ref, w_ref, o_ref):
    # Output block index_map ignores k, so o_ref stays VMEM-resident across
    # the whole K reduction: zero it once, accumulate in place (f32).
    @pl.when(pl.program_id(2) == 0)
    def _():
        o_ref[...] = jnp.zeros_like(o_ref)

    o_ref[...] += jnp.dot(
        x_ref[...], w_ref[...], preferred_element_type=jnp.float32
    )


# --------------------------------------------------------------- wrapper ----

_SINGLE_BLOCK_BYTES = 4 * 1024 * 1024  # below this footprint, skip the grid


def pallas_mm(x, w, *, tm=256, tn=256, tk=512):
    """out[M, N] = x[M, K] @ w[K, N] with f32 accumulation on the MXU."""
    M, K = x.shape
    K2, N = w.shape
    if K != K2:
        raise ValueError(f"inner dimensions must match, got {K} vs {K2}")
    out_dtype = jnp.result_type(x.dtype, w.dtype)

    cost = pl.CostEstimate(
        flops=2 * M * N * K,
        transcendentals=0,
        bytes_accessed=(M * K + K * N + M * N) * 4,
    )

    # ---- tiny-problem fast path: one VMEM block, no grid machinery --------
    footprint = 4 * (
        _round_up(M, 8) * _round_up(K, 128)
        + _round_up(K, 8) * _round_up(N, 128)
        + _round_up(M, 8) * _round_up(N, 128)
    )
    if footprint <= _SINGLE_BLOCK_BYTES:
        out = pl.pallas_call(
            _mm_single_block_kernel,
            out_shape=jax.ShapeDtypeStruct((M, N), jnp.float32),
            cost_estimate=cost,
        )(x, w)
        return out.astype(out_dtype)

    # ---- general tiled path ------------------------------------------------
    # Clamp tiles to the (aligned) problem size; keep them lane/sublane legal.
    tm = min(tm, _round_up(M, 8))
    tn = min(tn, _round_up(N, 128))
    tk = min(tk, _round_up(K, 128))

    Mp, Kp, Np = _round_up(M, tm), _round_up(K, tk), _round_up(N, tn)
    if (Mp, Kp) != (M, K):
        x = jnp.pad(x, ((0, Mp - M), (0, Kp - K)))
    if (Kp, Np) != (K, N):
        w = jnp.pad(w, ((0, Kp - K), (0, Np - N)))

    grid = (Mp // tm, Np // tn, Kp // tk)

    # VMEM budget: double-buffered input tiles + resident (double-buffered
    # across (i,j)) f32 output tile.  Only raise the scoped limit if needed,
    # and cap at 64 MiB so the same config is safe on v7x.
    itemsize = max(jnp.dtype(x.dtype).itemsize, jnp.dtype(w.dtype).itemsize)
    need = 2 * (tm * tk + tk * tn) * itemsize + 2 * tm * tn * 4
    compiler_kwargs = dict(
        dimension_semantics=("parallel", "parallel", "arbitrary"))
    if need > 30 * 1024 * 1024:
        compiler_kwargs["vmem_limit_bytes"] = min(
            need + 2 * 1024 * 1024, 64 * 1024 * 1024)

    out = pl.pallas_call(
        _mm_tiled_kernel,
        out_shape=jax.ShapeDtypeStruct((Mp, Np), jnp.float32),
        grid_spec=pltpu.PrefetchScalarGridSpec(
            num_scalar_prefetch=0,
            grid=grid,
            in_specs=[
                pl.BlockSpec((tm, tk), lambda i, j, k: (i, k)),
                pl.BlockSpec((tk, tn), lambda i, j, k: (k, j)),
            ],
            out_specs=pl.BlockSpec((tm, tn), lambda i, j, k: (i, j)),
        ),
        compiler_params=pltpu.CompilerParams(**compiler_kwargs),
        cost_estimate=cost,
    )(x, w)

    return out[:M, :N].astype(out_dtype)


class PallasModel:
    """JAX/Pallas equivalent of the PyTorch Model (mm with stored weight)."""

    def __init__(self, key, k_dim, n_dim, dtype=jnp.float32):
        # deterministic synthetic "parameter"
        self.weightings = jax.random.normal(key, (k_dim, n_dim), dtype=dtype)

    def __call__(self, input_data):
        return pallas_mm(input_data, self.weightings)


if __name__ == "__main__":
    key = jax.random.PRNGKey(0)
    k_x, k_w, k_x2, k_w2 = jax.random.split(key, 4)

    # Small demo consistent with torch.mm(input_data, self.weightings):
    #   input_data : (M=8,  K=32)   weightings : (K=32, N=128)
    M, K, N = 8, 32, 128
    x = jax.random.normal(k_x, (M, K), dtype=jnp.float32)
    model = PallasModel(k_w, K, N)

    out = jax.block_until_ready(model(x))
    ref = x @ model.weightings
    assert out.shape == (M, N)
    assert jnp.allclose(out, ref, atol=1e-4, rtol=1e-4), "mismatch (small path)"

    # Also exercise the general tiled/padded path (odd sizes, K reduction).
    M2, K2, N2 = 300, 700, 500
    x2 = jax.random.normal(k_x2, (M2, K2), dtype=jnp.float32)
    w2 = jax.random.normal(k_w2, (K2, N2), dtype=jnp.float32)
    out2 = jax.block_until_ready(pallas_mm(x2, w2))
    ref2 = x2 @ w2
    assert out2.shape == (M2, N2)
    assert jnp.allclose(out2, ref2, rtol=2e-2, atol=2e-1), "mismatch (tiled path)"

    print("KERNEL_OK")
</pallas_src>

<mosaic_0001>
module attributes {stable_mosaic.version = 11 : i64} {
  func.func @_mm_single_block_kernel(%arg0: memref<8x32xf32, #tpu.memory_space<vmem>>, %arg1: memref<32x128xf32, #tpu.memory_space<vmem>>, %arg2: memref<8x128xf32, #tpu.memory_space<vmem>>) attributes {dimension_semantics = [], scalar_prefetch = 0 : i64, scratch_operands = 0 : i64, tpu.core_type = #tpu.core_type<tc>} {
    %c0 = arith.constant 0 : index
    %c0_0 = arith.constant 0 : index
    %0 = vector.load %arg0[%c0, %c0_0] : memref<8x32xf32, #tpu.memory_space<vmem>>, vector<8x32xf32>
    %c0_1 = arith.constant 0 : index
    %c0_2 = arith.constant 0 : index
    %1 = vector.load %arg1[%c0_1, %c0_2] : memref<32x128xf32, #tpu.memory_space<vmem>>, vector<32x128xf32>
    %cst = arith.constant dense<0.000000e+00> : vector<8x128xf32>
    %2 = tpu.matmul %0, %1, %cst {dimension_numbers = #tpu.dot_dimension_numbers<[1], [0], [0], [1], [0, 0, 1, 1], [], []>} : vector<8x32xf32>, vector<32x128xf32>, vector<8x128xf32> -> vector<8x128xf32>
    %c0_3 = arith.constant 0 : index
    %c0_4 = arith.constant 0 : index
    %3 = vector.load %arg2[%c0_3, %c0_4] : memref<8x128xf32, #tpu.memory_space<vmem>>, vector<8x128xf32>
    tpu.vector_store %arg2[%c0_3, %c0_4], %2 {strides = array<i32>} : memref<8x128xf32, #tpu.memory_space<vmem>>, vector<8x128xf32>,
    return
  }
}

</mosaic_0001>

<bundles_post_ra>
// kernel: tpu_custom_call.1
= control target key start
LH: loop header
LB: loop body
LE: loop exit
PB: predicated region body
PF: predicated region fallthrough
CT: control target
= control target key end

     0   :  { %7 = vsyncpa [#allocation3], 0  ;;  %s303_s0 = inlined_call_operand.hbm [shape: f32[8,32], index: 0, kind: input, shape index: {}]   ;;  %s304_s1 = inlined_call_operand.hbm [shape: f32[32,128], index: 1, kind: input, shape index: {}]   ;;  %s305_s2 = inlined_call_operand.hbm [shape: f32[8,128], index: 2, kind: output, shape index: {}]  }
   0x1   :  { %8 = vsyncpa [#allocation6], 0 }
   0x2   :  { %9 = vsyncpa [#allocation4], 0  ;;  %s237_s9 = smov [#allocation2]   ;;  %s238_s11 = smov [#allocation5]  }
   0x3   :  { %s16_s10 = sshll.u32 %s237_s9, 4  ;;  %s25_s12 = sshll.u32 %s238_s11, 4  ;;  %s17_s10 = int_to_ptr.vmem [resolvable:$true] %s16_s10  ;;  %s260_s12 = int_to_ptr.vmem [resolvable:$true] %s25_s12 }
   0x4   :  { %s165_s15 = scalar_lea.hbm %s303_s0, 128 }
   0x5   :  { %p166_p0 = scmp.ne.s32.totalorder %s303_s0, %s165_s15  ;;  %p169_p1 = scmp.lt.u32.totalorder %s165_s15, %s303_s0 }
   0x7   :  { %p171_p2 = pnand %p169_p1, %p166_p0 }
   0x9   :  { %174 = shalt.err (!%p171_p2)
}
   0xa   :  { %s175_s20 = scalar_lea.vmem %s17_s10, 128  ;;  %p180_p4 = scmp.lt.s32.totalorder %s17_s10, %s17_s10 }
   0xb   :  { %p176_p3 = scmp.ne.s32.totalorder %s17_s10, %s175_s20  ;;  %p181_p5 = scmp.lt.s32.totalorder %s175_s20, %s175_s20 }
   0xd   :  { %p182_p6 = por %p181_p5, %p180_p4 }
   0xf   :  { %p183_p7 = pnand %p182_p6, %p176_p3 }
  0x11   :  { %186 = shalt.err (!%p183_p7)
}
  0x12   :  { %19 = dma.hbm_to_vmem [thread:$0]  %s303_s0, 128, %s17_s10, [#allocation3]  }
  0x13   :  { %s187_s25 = scalar_lea.hbm %s304_s1, 512 }
  0x14   :  { %p188_p8 = scmp.ne.s32.totalorder %s304_s1, %s187_s25  ;;  %p191_p9 = scmp.lt.u32.totalorder %s187_s25, %s304_s1 }
  0x16   :  { %p193_p10 = pnand %p191_p9, %p188_p8 }
  0x18   :  { %196 = shalt.err (!%p193_p10)
}
  0x19   :  { %s197_s30 = scalar_lea.vmem %s260_s12, 512  ;;  %p202_p12 = scmp.lt.s32.totalorder %s260_s12, %s260_s12 }
  0x1a   :  { %p198_p11 = scmp.ne.s32.totalorder %s260_s12, %s197_s30  ;;  %p203_p13 = scmp.lt.s32.totalorder %s197_s30, %s197_s30 }
  0x1c   :  { %p204_p0 = por %p203_p13, %p202_p12 }
  0x1e   :  { %p205_p1 = pnand %p204_p0, %p198_p11 }
  0x20   :  { %208 = shalt.err (!%p205_p1)
}
  0x21   :  { %s239_s0 = smov 128   ;;  %s240_s3 = smov 8  }
  0x22   :  { %31 = dma.hbm_to_vmem [thread:$0]  %s304_s1, 512, %s260_s12, [#allocation6], %s239_s0, %s239_s0, %s240_s3  }
  0x23   :  { %231 = dma.done.wait [#allocation3], 128  }
  0x24   :  { %232 = vsyncadd [#allocation3], 4294967168 }
  0x25   :  { %233 = dma.done.wait [#allocation6], 512  }
  0x26   :  { %234 = vsyncadd [#allocation6], 4294966784  ;;  %v241_v0 = vmov 0.0|0.0   ;;  %vm242_vm0 = vmmov 0   ;;  %v243_v1 = vmov 0.0   ;;  %v39_v2 = vld [vmem:[#allocation5] sm:$0xff] }
  0x27   :  { %151 = vmatprep.subr.bf16.mxu0 %v241_v0  ;;  %148 = vmatprep.mubr.msk.f32.mxu0 %vm242_vm0, %v243_v1  ;;  %v40_v3 = vld [vmem:[#allocation5 + $0x8] sm:$0xff]  ;;  %v41_v4 = vld [vmem:[#allocation5 + $0x10] sm:$0xff]  ;;  %v42_v6 = vld [vmem:[#allocation5 + $0x18] sm:$0xff]  ;;  %vm43_vm1 = vcmask 261120   ;;  %s244_s1 = smov [#allocation7]  }
  0x28   :  { %v152_v5 = vpack.c.bf16 %v40_v3, %v39_v2  ;;  %v155_v7 = vpack.c.bf16 %v42_v6, %v41_v4  ;;  %v38_v8 = vld [vmem:[#allocation2] sm:$0xff]  ;;  %s124_s6 = sshll.u32 %s244_s1, 4  ;;  %s125_s6 = int_to_ptr.vmem [resolvable:$true] %s124_s6 }
  0x29   :  { %s209_s7 = scalar_lea.vmem %s125_s6, 128  ;;  %p214_p3 = scmp.lt.s32.totalorder %s125_s6, %s125_s6 }
  0x2a   :  { %153 = vmatpush3.bf16.msra.mxu0 %v152_v5  ;;  %p210_p2 = scmp.ne.s32.totalorder %s125_s6, %s209_s7  ;;  %p215_p4 = scmp.lt.s32.totalorder %s209_s7, %s209_s7 }
  0x2b   :  { %154 = vmatprep.subr.bf16.mxu0 %v241_v0 }
  0x2c   :  { %p216_p5 = por %p215_p4, %p214_p3 }
  0x2e   :  { %156 = vmatpush3.bf16.msra.mxu0 %v155_v7  ;;  %p217_p6 = pnand %p216_p5, %p210_p2 }
  0x31   :  { %149 = vmatmul.mubr.msk.f32.vlgmr.msra.gmra.mrb[0].mxu0 %vm43_vm1, %v38_v8 }
 0x104   :  { %v113_v9 = vpop.f32.mrb[0].mxu0 }
 0x105   :  { %117 = vst [vmem:[#allocation7] sm:$0xff] %v113_v9  ;;  %v150_v10 = vpop.f32.mrb[1].mxu0 }
 0x106   :  { %220 = shalt.err (!%p217_p6)
}
 0x107   :  { %s221_s10 = scalar_lea.hbm %s305_s2, 128 }
 0x108   :  { %p222_p7 = scmp.ne.s32.totalorder %s305_s2, %s221_s10  ;;  %p225_p8 = scmp.lt.u32.totalorder %s221_s10, %s305_s2 }
 0x10a   :  { %p227_p9 = pnand %p225_p8, %p222_p7 }
 0x10c   :  { %230 = shalt.err (!%p227_p9)
}
 0x10d   :  { %127 = dma.vmem_to_hbm [thread:$0]  %s125_s6, 128, %s305_s2, [#allocation4]  }
 0x10e   :  { %235 = dma.done.wait [#allocation4], 128  }
 0x10f   :  { %236 = vsyncadd [#allocation4], 4294967168 }
 0x110   :  { %131 = vsyncpa [#allocation3], 1 }
 0x111   :  { %132 = vsyncpa [#allocation6], 1 }
 0x112   :  { %133 = vsyncpa [#allocation4], 1 }

</bundles_post_ra>
